<compile_context>
chip_gen: v5e
topology: v5e:2x2
jax: 0.10.0
libtpu: 0.0.40
codegen_flags: <defaults>
</compile_context>

<pallas_src>
import jax
import jax.numpy as jnp
import numpy as np
from jax.experimental import pallas as pl
from jax.experimental.pallas import tpu as pltpu

FEAT = 2
HIDDEN = 32
LEAKY_SLOPE = 0.01  # PyTorch nn.LeakyReLU default negative_slope


def _leaky_relu(x):
    return jnp.where(x > 0, x, LEAKY_SLOPE * x)


def coupling_kernel(x_ref, vec_ref, mat_ref, y_ref, ld_ref):
    # x_ref: (2, TB) f32, batch on lanes.
    x = x_ref[...]

    # ---- packed parameters (resident in VMEM across the whole grid) ----
    w1c0 = vec_ref[:, 0:1]        # (64, 1)  fused first-layer weight, column for feature 0
    w1c1 = vec_ref[:, 1:2]        # (64, 1)  ... feature 1
    b1 = vec_ref[:, 2:3]          # (64, 1)
    b2 = vec_ref[:, 3:4]          # (64, 1)
    b3 = vec_ref[0:4, 4:5]        # (4, 1)
    mask = vec_ref[0:2, 5:6]      # (2, 1)
    scale = vec_ref[0:2, 6:7]     # (2, 1)
    inv_mask = 1.0 - mask

    w2 = mat_ref[0:64, :]         # (64, 64)  block-diag [s_w2 | t_w2]
    w3 = mat_ref[64:68, :]        # (4, 64)   block-diag [s_w3 | t_w3]

    # ---- coupling-layer math (transposed layout: features x batch) ----
    x1 = x * mask                 # (2, TB) masked half (passes through)
    x2 = x * inv_mask             # (2, TB) half to be transformed

    # First layer (K=2): two rank-1 VPU updates instead of a tiny MXU matmul.
    h = w1c0 * x1[0:1, :] + w1c1 * x1[1:2, :] + b1            # (64, TB)
    h = _leaky_relu(h)

    # Second layer: fused s/t as one (64,64) block-diagonal MXU matmul.
    h = jnp.dot(w2, h, preferred_element_type=jnp.float32) + b2
    h = _leaky_relu(h)

    # Output layer: fused (4,64) matmul; rows 0:2 = s, rows 2:4 = t.
    out = jnp.dot(w3, h, preferred_element_type=jnp.float32) + b3   # (4, TB)

    s = out[0:2, :]                                   # (2, TB)
    t = out[2:4, :] * inv_mask                        # (2, TB)
    scale_s = s * scale                               # (2, TB)

    y = x1 + (jnp.exp(scale_s) * x2 + t) * inv_mask
    y_ref[...] = y

    ld = scale_s * inv_mask
    ld_ref[...] = ld[0:1, :] + ld[1:2, :]             # (1, TB) lane-dense


def pack_params(params):
    """Pack the 14 tiny tensors into two contiguous buffers.

    vec (64, 8): col0/col1 = fused first-layer weight columns, col2 = b1,
                 col3 = b2, col4[:4] = b3, col5[:2] = mask, col6[:2] = scale.
    mat (72, 64): rows 0:64 = block-diag second-layer weight,
                  rows 64:68 = block-diag output-layer weight.
    Weights are stored (out, in) so the kernel computes W @ X (batch on lanes).
    """
    f32 = jnp.float32
    w1f = jnp.concatenate([params["sw1"].T, params["tw1"].T], axis=0)   # (64, 2)
    b1f = jnp.concatenate([params["sb1"][0], params["tb1"][0]])         # (64,)
    b2f = jnp.concatenate([params["sb2"][0], params["tb2"][0]])         # (64,)
    b3f = jnp.concatenate([params["sb3"][0], params["tb3"][0]])         # (4,)

    w2blk = jnp.zeros((64, 64), f32)
    w2blk = w2blk.at[0:32, 0:32].set(params["sw2"].T)
    w2blk = w2blk.at[32:64, 32:64].set(params["tw2"].T)

    w3f = jnp.zeros((4, 64), f32)
    w3f = w3f.at[0:2, 0:32].set(params["sw3"].T)
    w3f = w3f.at[2:4, 32:64].set(params["tw3"].T)

    vec = jnp.zeros((64, 8), f32)
    vec = vec.at[:, 0].set(w1f[:, 0])
    vec = vec.at[:, 1].set(w1f[:, 1])
    vec = vec.at[:, 2].set(b1f)
    vec = vec.at[:, 3].set(b2f)
    vec = vec.at[0:4, 4].set(b3f)
    vec = vec.at[0:2, 5].set(params["mask"][0])
    vec = vec.at[0:2, 6].set(params["scale"][0])

    mat = jnp.zeros((72, 64), f32)
    mat = mat.at[0:64, :].set(w2blk)
    mat = mat.at[64:68, :].set(w3f)
    return vec, mat


def coupling_forward(x, params, *, block_b=2048):
    """Pallas-backed forward. Returns (y, log_det_jac) matching the PyTorch module."""
    B = x.shape[0]
    xt = jnp.asarray(x, jnp.float32).T                      # (2, B) batch on lanes

    # Lane-multiple batch block; pad B up to a multiple of the block.
    tb = max(128, min(block_b, pl.cdiv(B, 128) * 128))
    padded_b = pl.cdiv(B, tb) * tb
    if padded_b != B:
        xt = jnp.pad(xt, ((0, 0), (0, padded_b - B)))

    vec, mat = pack_params(params)
    grid = (padded_b // tb,)

    y_t, ld = pl.pallas_call(
        coupling_kernel,
        out_shape=(
            jax.ShapeDtypeStruct((FEAT, padded_b), jnp.float32),
            jax.ShapeDtypeStruct((1, padded_b), jnp.float32),
        ),
        grid=grid,
        in_specs=[
            pl.BlockSpec((FEAT, tb), lambda i: (0, i)),     # x: streamed over batch
            pl.BlockSpec((64, 8), lambda i: (0, 0)),        # packed vec params (resident)
            pl.BlockSpec((72, 64), lambda i: (0, 0)),       # packed mat params (resident)
        ],
        out_specs=(
            pl.BlockSpec((FEAT, tb), lambda i: (0, i)),     # y
            pl.BlockSpec((1, tb), lambda i: (0, i)),        # log_det (lane-dense)
        ),
        compiler_params=pltpu.CompilerParams(
            dimension_semantics=("parallel",),
        ),
    )(xt, vec, mat)

    y = y_t[:, :B].T                                        # (B, 2)
    log_det = ld[0, :B]                                     # (B,)
    return y, log_det


def coupling_forward_ref(x, params):
    """Pure-JAX reference (mirrors the PyTorch forward exactly, (B, 2) layout)."""
    mask = params["mask"]
    inv_mask = 1.0 - mask
    x1 = x * mask
    x2 = x * inv_mask

    def mlp(w1, b1, w2, b2, w3, b3, inp):
        h = inp @ w1 + b1
        h = jnp.where(h > 0, h, LEAKY_SLOPE * h)
        h = h @ w2 + b2
        h = jnp.where(h > 0, h, LEAKY_SLOPE * h)
        return h @ w3 + b3

    s = mlp(params["sw1"], params["sb1"], params["sw2"], params["sb2"],
            params["sw3"], params["sb3"], x1)
    t = mlp(params["tw1"], params["tb1"], params["tw2"], params["tb2"],
            params["tw3"], params["tb3"], x1) * inv_mask
    scale_s = s * params["scale"]
    y = x1 + (jnp.exp(scale_s) * x2 + t) * inv_mask
    log_det = jnp.sum(scale_s * inv_mask, axis=1)
    return y, log_det


def init_params(key):
    """PyTorch-default init: Linear weights/biases ~ U(-1/sqrt(fan_in), 1/sqrt(fan_in)).
    Weights stored (in, out); scale_factor starts at 0.0 as in the module __init__."""
    def linear(k, fan_in, fan_out):
        kw, kb = jax.random.split(k)
        bound = 1.0 / np.sqrt(fan_in)
        w = jax.random.uniform(kw, (fan_in, fan_out), jnp.float32, -bound, bound)
        b = jax.random.uniform(kb, (1, fan_out), jnp.float32, -bound, bound)
        return w, b

    keys = jax.random.split(key, 6)
    sw1, sb1 = linear(keys[0], FEAT, HIDDEN)
    sw2, sb2 = linear(keys[1], HIDDEN, HIDDEN)
    sw3, sb3 = linear(keys[2], HIDDEN, FEAT)
    tw1, tb1 = linear(keys[3], FEAT, HIDDEN)
    tw2, tb2 = linear(keys[4], HIDDEN, HIDDEN)
    tw3, tb3 = linear(keys[5], HIDDEN, FEAT)

    return {
        "mask": jnp.array([[1.0, 0.0]], dtype=jnp.float32),   # (1, 2)
        "scale": jnp.zeros((1, FEAT), dtype=jnp.float32),     # fill_(0.0)
        "sw1": sw1, "sb1": sb1, "sw2": sw2, "sb2": sb2, "sw3": sw3, "sb3": sb3,
        "tw1": tw1, "tb1": tb1, "tw2": tw2, "tb2": tb2, "tw3": tw3, "tb3": tb3,
    }


if __name__ == "__main__":
    key = jax.random.PRNGKey(0)
    k_param, k_x = jax.random.split(key)

    params = init_params(k_param)
    B = 1000                                  # exercises padding + multi-step grid
    x = jax.random.normal(k_x, (B, FEAT), dtype=jnp.float32)

    y, log_det = coupling_forward(x, params, block_b=256)
    y = jax.block_until_ready(y)
    log_det = jax.block_until_ready(log_det)

    y_ref, ld_ref = coupling_forward_ref(x, params)
    np.testing.assert_allclose(np.asarray(y), np.asarray(y_ref), rtol=2e-5, atol=2e-5)
    np.testing.assert_allclose(np.asarray(log_det), np.asarray(ld_ref), rtol=2e-5, atol=2e-5)

    print("KERNEL_OK")
</pallas_src>

<mosaic_0001>
module attributes {stable_mosaic.version = 11 : i64} {
  func.func @coupling_kernel(%arg0: i32, %arg1: memref<2x256xf32, #tpu.memory_space<vmem>>, %arg2: memref<64x8xf32, #tpu.memory_space<vmem>>, %arg3: memref<72x64xf32, #tpu.memory_space<vmem>>, %arg4: memref<2x256xf32, #tpu.memory_space<vmem>>, %arg5: memref<1x256xf32, #tpu.memory_space<vmem>>) attributes {dimension_semantics = [#tpu.dimension_semantics<parallel>], iteration_bounds = array<i64: 4>, scalar_prefetch = 0 : i64, scratch_operands = 0 : i64, tpu.core_type = #tpu.core_type<tc>, window_params = [{transform_indices = @transform_0, window_bounds = array<i64: 2, 256>}, {pipeline_mode = #tpu.pipeline_mode<synchronous>, transform_indices = @transform_1, window_bounds = array<i64: 64, 8>}, {pipeline_mode = #tpu.pipeline_mode<synchronous>, transform_indices = @transform_2, window_bounds = array<i64: 72, 64>}, {transform_indices = @transform_3, window_bounds = array<i64: 2, 256>}, {transform_indices = @transform_4, window_bounds = array<i64: 1, 256>}]} {
    %c0 = arith.constant 0 : index
    %c0_0 = arith.constant 0 : index
    %0 = vector.load %arg1[%c0, %c0_0] : memref<2x256xf32, #tpu.memory_space<vmem>>, vector<2x256xf32>
    %c0_1 = arith.constant 0 : index
    %c0_2 = arith.constant 0 : index
    %1 = vector.load %arg2[%c0_1, %c0_2] : memref<64x8xf32, #tpu.memory_space<vmem>>, vector<64x1xf32>
    %c0_3 = arith.constant 0 : index
    %c1 = arith.constant 1 : index
    %2 = vector.load %arg2[%c0_3, %c1] : memref<64x8xf32, #tpu.memory_space<vmem>>, vector<64x1xf32>
    %c0_4 = arith.constant 0 : index
    %c2 = arith.constant 2 : index
    %3 = vector.load %arg2[%c0_4, %c2] : memref<64x8xf32, #tpu.memory_space<vmem>>, vector<64x1xf32>
    %c0_5 = arith.constant 0 : index
    %c3 = arith.constant 3 : index
    %4 = vector.load %arg2[%c0_5, %c3] : memref<64x8xf32, #tpu.memory_space<vmem>>, vector<64x1xf32>
    %c0_6 = arith.constant 0 : index
    %c4 = arith.constant 4 : index
    %5 = vector.load %arg2[%c0_6, %c4] : memref<64x8xf32, #tpu.memory_space<vmem>>, vector<4x1xf32>
    %c0_7 = arith.constant 0 : index
    %c5 = arith.constant 5 : index
    %6 = vector.load %arg2[%c0_7, %c5] : memref<64x8xf32, #tpu.memory_space<vmem>>, vector<2x1xf32>
    %c0_8 = arith.constant 0 : index
    %c6 = arith.constant 6 : index
    %7 = vector.load %arg2[%c0_8, %c6] : memref<64x8xf32, #tpu.memory_space<vmem>>, vector<2x1xf32>
    %cst = arith.constant 1.000000e+00 : f32
    %8 = vector.broadcast %cst : f32 to vector<2x1xf32>
    %9 = arith.subf %8, %6 : vector<2x1xf32>
    %c0_9 = arith.constant 0 : index
    %c0_10 = arith.constant 0 : index
    %10 = vector.load %arg3[%c0_9, %c0_10] : memref<72x64xf32, #tpu.memory_space<vmem>>, vector<64x64xf32>
    %c64 = arith.constant 64 : index
    %c0_11 = arith.constant 0 : index
    %11 = vector.load %arg3[%c64, %c0_11] : memref<72x64xf32, #tpu.memory_space<vmem>>, vector<4x64xf32>
    %12 = vector.broadcast %6 : vector<2x1xf32> to vector<2x256xf32>
    %13 = arith.mulf %0, %12 : vector<2x256xf32>
    %14 = vector.broadcast %9 : vector<2x1xf32> to vector<2x256xf32>
    %15 = arith.mulf %0, %14 : vector<2x256xf32>
    %16 = vector.extract_strided_slice %13 {offsets = [0, 0], sizes = [1, 256], strides = [1, 1]} : vector<2x256xf32> to vector<1x256xf32>
    %17 = vector.broadcast %1 : vector<64x1xf32> to vector<64x256xf32>
    %18 = vector.broadcast %16 : vector<1x256xf32> to vector<64x256xf32>
    %19 = arith.mulf %17, %18 : vector<64x256xf32>
    %20 = vector.extract_strided_slice %13 {offsets = [1, 0], sizes = [1, 256], strides = [1, 1]} : vector<2x256xf32> to vector<1x256xf32>
    %21 = vector.broadcast %2 : vector<64x1xf32> to vector<64x256xf32>
    %22 = vector.broadcast %20 : vector<1x256xf32> to vector<64x256xf32>
    %23 = arith.mulf %21, %22 : vector<64x256xf32>
    %24 = arith.addf %19, %23 : vector<64x256xf32>
    %25 = vector.broadcast %3 : vector<64x1xf32> to vector<64x256xf32>
    %26 = arith.addf %24, %25 : vector<64x256xf32>
    %cst_12 = arith.constant 0.000000e+00 : f32
    %27 = vector.broadcast %cst_12 : f32 to vector<64x256xf32>
    %28 = arith.cmpf ogt, %26, %27 : vector<64x256xf32>
    %cst_13 = arith.constant 0.00999999977 : f32
    %29 = vector.broadcast %cst_13 : f32 to vector<64x256xf32>
    %30 = arith.mulf %29, %26 : vector<64x256xf32>
    %31 = arith.select %28, %26, %30 : vector<64x256xi1>, vector<64x256xf32>
    %cst_14 = arith.constant dense<0.000000e+00> : vector<64x256xf32>
    %32 = tpu.matmul %10, %31, %cst_14 {dimension_numbers = #tpu.dot_dimension_numbers<[1], [0], [0], [1], [0, 0, 1, 1], [], []>} : vector<64x64xf32>, vector<64x256xf32>, vector<64x256xf32> -> vector<64x256xf32>
    %33 = vector.broadcast %4 : vector<64x1xf32> to vector<64x256xf32>
    %34 = arith.addf %32, %33 : vector<64x256xf32>
    %cst_15 = arith.constant 0.000000e+00 : f32
    %35 = vector.broadcast %cst_15 : f32 to vector<64x256xf32>
    %36 = arith.cmpf ogt, %34, %35 : vector<64x256xf32>
    %cst_16 = arith.constant 0.00999999977 : f32
    %37 = vector.broadcast %cst_16 : f32 to vector<64x256xf32>
    %38 = arith.mulf %37, %34 : vector<64x256xf32>
    %39 = arith.select %36, %34, %38 : vector<64x256xi1>, vector<64x256xf32>
    %cst_17 = arith.constant dense<0.000000e+00> : vector<4x256xf32>
    %40 = tpu.matmul %11, %39, %cst_17 {dimension_numbers = #tpu.dot_dimension_numbers<[1], [0], [0], [1], [0, 0, 1, 1], [], []>} : vector<4x64xf32>, vector<64x256xf32>, vector<4x256xf32> -> vector<4x256xf32>
    %41 = vector.broadcast %5 : vector<4x1xf32> to vector<4x256xf32>
    %42 = arith.addf %40, %41 : vector<4x256xf32>
    %43 = vector.extract_strided_slice %42 {offsets = [0, 0], sizes = [2, 256], strides = [1, 1]} : vector<4x256xf32> to vector<2x256xf32>
    %44 = vector.extract_strided_slice %42 {offsets = [2, 0], sizes = [2, 256], strides = [1, 1]} : vector<4x256xf32> to vector<2x256xf32>
    %45 = vector.broadcast %9 : vector<2x1xf32> to vector<2x256xf32>
    %46 = arith.mulf %44, %45 : vector<2x256xf32>
    %47 = vector.broadcast %7 : vector<2x1xf32> to vector<2x256xf32>
    %48 = arith.mulf %43, %47 : vector<2x256xf32>
    %49 = math.exp %48 : vector<2x256xf32>
    %50 = arith.mulf %49, %15 : vector<2x256xf32>
    %51 = arith.addf %50, %46 : vector<2x256xf32>
    %52 = vector.broadcast %9 : vector<2x1xf32> to vector<2x256xf32>
    %53 = arith.mulf %51, %52 : vector<2x256xf32>
    %54 = arith.addf %13, %53 : vector<2x256xf32>
    %c0_18 = arith.constant 0 : index
    %c0_19 = arith.constant 0 : index
    %55 = vector.load %arg4[%c0_18, %c0_19] : memref<2x256xf32, #tpu.memory_space<vmem>>, vector<2x256xf32>
    tpu.vector_store %arg4[%c0_18, %c0_19], %54 {strides = array<i32>} : memref<2x256xf32, #tpu.memory_space<vmem>>, vector<2x256xf32>,
    %56 = vector.broadcast %9 : vector<2x1xf32> to vector<2x256xf32>
    %57 = arith.mulf %48, %56 : vector<2x256xf32>
    %58 = vector.extract_strided_slice %57 {offsets = [0, 0], sizes = [1, 256], strides = [1, 1]} : vector<2x256xf32> to vector<1x256xf32>
    %59 = vector.extract_strided_slice %57 {offsets = [1, 0], sizes = [1, 256], strides = [1, 1]} : vector<2x256xf32> to vector<1x256xf32>
    %60 = arith.addf %58, %59 : vector<1x256xf32>
    %c0_20 = arith.constant 0 : index
    %c0_21 = arith.constant 0 : index
    %61 = vector.load %arg5[%c0_20, %c0_21] : memref<1x256xf32, #tpu.memory_space<vmem>>, vector<1x256xf32>
    tpu.vector_store %arg5[%c0_20, %c0_21], %60 {strides = array<i32>} : memref<1x256xf32, #tpu.memory_space<vmem>>, vector<1x256xf32>,
    return
  }
  func.func @transform_0(%arg0: i32) -> (i32, i32) {
    %c0_i32 = arith.constant 0 : i32
    %c0_i32_0 = arith.constant 0 : i32
    return %c0_i32, %arg0 : i32, i32
  }
  func.func @transform_1(%arg0: i32) -> (i32, i32) {
    %c0_i32 = arith.constant 0 : i32
    %c0_i32_0 = arith.constant 0 : i32
    %c0_i32_1 = arith.constant 0 : i32
    return %c0_i32, %c0_i32_0 : i32, i32
  }
  func.func @transform_2(%arg0: i32) -> (i32, i32) {
    %c0_i32 = arith.constant 0 : i32
    %c0_i32_0 = arith.constant 0 : i32
    %c0_i32_1 = arith.constant 0 : i32
    return %c0_i32, %c0_i32_0 : i32, i32
  }
  func.func @transform_3(%arg0: i32) -> (i32, i32) {
    %c0_i32 = arith.constant 0 : i32
    %c0_i32_0 = arith.constant 0 : i32
    return %c0_i32, %arg0 : i32, i32
  }
  func.func @transform_4(%arg0: i32) -> (i32, i32) {
    %c0_i32 = arith.constant 0 : i32
    %c0_i32_0 = arith.constant 0 : i32
    return %c0_i32, %arg0 : i32, i32
  }
}

</mosaic_0001>

<bundles_post_ra>
// kernel: tpu_custom_call.1
= control target key start
LH: loop header
LB: loop body
LE: loop exit
PB: predicated region body
PF: predicated region fallthrough
CT: control target
= control target key end

     0   :  { %10 = vsyncpa [#allocation3], 0  ;;  %s1477_s0 = inlined_call_operand.vmem [shape: f32[2,1024], index: 0, kind: input, shape index: {}]   ;;  %s1478_s1 = inlined_call_operand.vmem [shape: f32[64,8], index: 1, kind: input, shape index: {}]   ;;  %s1479_s2 = inlined_call_operand.vmem [shape: f32[72,64], index: 2, kind: input, shape index: {}]   ;;  %s1480_s3 = inlined_call_operand.hbm [shape: f32[2,1024], index: 3, kind: output, shape index: {0}]   ;;  %s1481_s4 = inlined_call_operand.hbm [shape: f32[1,1024], index: 4, kind: output, shape index: {1}]  }
   0x1   :  { %12 = vsyncpa [#allocation3 + $0x1], 0 }
   0x2   :  { %13 = vsyncpa [#allocation5], 0 }
   0x3   :  { %15 = vsyncpa [#allocation5 + $0x1], 0  ;;  %s1158_s15 = smov 0   ;;  %s1160_s16 = smov 0  }
   0x4   :  { %s1162_s17 = smov 0   ;;  %s1164_s18 = smov 0  }
   0x5 LB: > { %s1179_s19 = sadd.s32 4294967295, %s1123_s18   ;;  %s906_s20 = sadd.s32 4294967294, %s1123_s18   ;;  %s1123_s18 = sphi %s1164_s18, %s1487_s18   ;;  %s1119_s17 = sphi %s1162_s17, %s1486_s17   ;;  %s1115_s16 = sphi %s1160_s16, %s1485_s16   ;;  %s1111_s15 = sphi %s1158_s15, %s1484_s15  }
   0x6   : > { %s1183_s21 = sadd.s32 1, %s1123_s18   ;;  %s96_s22 = sadd.s32 1, %s1119_s17 }
   0x7   : > { %s93_s23 = ssub.s32 %s1123_s18, %s1183_s21  ;;  %p106_p0 = scmp.ne.s32.totalorder %s1119_s17, %s1115_s16 }
   0x8   : > { %p94_p1 = scmp.eq.s32.totalorder %s93_s23, 0  ;;  %p107_p2 = scmp.eq.s32.totalorder %s1179_s19, 3 }
   0x9   : > { %p112_p3 = scmp.ne.s32.totalorder %s1115_s16, %s1111_s15  ;;  %p113_p4 = scmp.eq.s32.totalorder %s906_s20, 3 }
   0xa   : > { %s1194_s24 = scalar_select %p94_p1, %s1119_s17, %s96_s22  }
   0xb   : > { %p1196_p5 = por %p107_p2, %p106_p0  ;;  %p1200_p6 = por %p113_p4, %p112_p3 }
   0xc   : > { %p909_p7 = scmp.ge.s32.totalorder %s1123_s18, 1  ;;  %p172_p8 = scmp.lt.s32.totalorder %s1123_s18, 5 }
   0xe   : > { %p173_p9 = pnand %p909_p7, %p172_p8 }
   0xf   : > { %s1278_s28 = sshll.u32 (!%p173_p9), %s1179_s19, 1  ;;  %s1417_s12 = sand.u32 (!%p173_p9), 1, %s1115_s16  }
  0x10   : > { %176 = sbr.rel (%p173_p9) target bundleno = 548 (0x224), region = 32  ;;  %p204_p10 = scmp.lt.s32.totalorder (!%p173_p9), %s1278_s28, 7 }
  0x11   : > { %s911_s13 = sshll.u32 (!%p173_p9), %s1417_s12, 1  ;;  %s809_s22 = scalar_lea.hbm (!%p173_p9), %s1481_s4, %s1278_s28 }
  0x12   : > { %s202_s23 = scalar_lea.vmem (!%p173_p9), [#allocation4], %s911_s13  ;;  %s784_s5 = scalar_lea.sflag (!%p173_p9), [#allocation5], %s1417_s12 }
  0x13   : > { %s811_s27 = sshll.u32 (!%p173_p9), %s202_s23, 4  ;;  %s1049_s10 = scalar_lea.hbm (!%p173_p9), %s1481_s4, 8  ;;  %s812_s27 = int_to_ptr.vmem [resolvable:$true] %s811_s27 }
  0x15   : > { %v1209_v0 = vld [vmem:[%s1478_s1] sm:$0x3]  ;;  %v1214_v1 = vld [vmem:[%s1478_s1 + $0x38] sm:$0xff]  ;;  %v1219_v2 = vld [vmem:[%s1478_s1 + $0x30] sm:$0xff]  ;;  %v1125_v3 = vmov 1   ;;  %v1126_v4 = vmov 5  }
  0x16   : > { %1012 = vset.pattern.permute.xlu2 %v1125_v3  ;;  %1010 = vset.pattern.permute.xlu1 %v1125_v3  ;;  %v1127_v5 = vmov 0   ;;  %v1228_v6 = vld [vmem:[%s1478_s1 + $0x28] sm:$0xff]  ;;  %v1236_v7 = vld [vmem:[%s1478_s1 + $0x20] sm:$0xff]  ;;  %v1128_v8 = vmov 2   ;;  %v1244_v9 = vld [vmem:[%s1478_s1 + $0x18] sm:$0xff]  ;;  %s205_s29 = scalar_select %p204_p10, %s1278_s28, 7 }
  0x17   : > { %1008 = vset.pattern.permute.xlu0 %v1126_v4  ;;  %345 = vperm.xlu1 %1010, %v1214_v1   ;;  %v1252_v10 = vld [vmem:[%s1478_s1 + $0x10] sm:$0xff]  ;;  %v1260_v11 = vld [vmem:[%s1478_s1 + $0x8] sm:$0xff]  ;;  %v1268_v12 = vld [vmem:[%s1478_s1] sm:$0xff]  ;;  %v1129_v15 = vmov 269488144   ;;  %s910_s28 = sshll.u32 %s1417_s12, 2 }
  0x18   : > { %234 = vperm.xlu0 %1008, %v1209_v0   ;;  %341 = vperm.xlu2 %1012, %v1219_v2   ;;  %v1282_v16 = vunpack.c.l.s4 %v1129_v15  ;;  %s913_s30 = sshll.u32 %s205_s29, 1  ;;  %s1427_s29 = sshll.u32 %s809_s22, 4  ;;  %s814_s29 = int_to_ptr.hbm [resolvable:$true] %s1427_s29 }
  0x19   : > { %s207_s7 = scalar_lea.vmem %s1477_s0, %s913_s30  ;;  %s939_s30 = sshll.u32 %s1179_s19, 2 }
  0x1a   : > { %v238_v18 = vunpack.c.0.s8 %v1282_v16  ;;  %v1288_v21 = vld [vmem:[%s207_s7] sm:$0xf]  ;;  %s1043_s6 = sshra.s32 %s814_s29, 4  ;;  %s1044_s6 = int_to_ptr.hbm [resolvable:$true] %s1043_s6 }
  0x1b   : > { %s1045_s7 = scalar_lea.hbm %s1044_s6, 2  ;;  %p1050_p0 = scmp.lt.s32.totalorder %s1044_s6, %s1481_s4 }
  0x1c   : > { %p1046_p11 = scmp.ne.s32.totalorder %s1044_s6, %s1045_s7  ;;  %p1051_p1 = scmp.lt.s32.totalorder %s1049_s10, %s1045_s7 }
  0x1e   : > { %p1047_p12 = pnand %p1046_p11, %p1196_p5  ;;  %p1052_p2 = por %p1051_p1, %p1050_p0 }
  0x1f   : > { %1011 = vset.pattern.permute.xlu1 %v1127_v5 }
  0x20   : > { %1009 = vset.pattern.permute.xlu0 %v1127_v5  ;;  %1013 = vset.pattern.permute.xlu2 %v1127_v5  ;;  %p1048_p13 = pneg %p1047_p12 }
  0x21   : > { %290 = vperm.xlu0 %1009, %v1214_v1   ;;  %285 = vperm.xlu1 %1011, %v1219_v2  }
  0x22   : > { %280 = vperm.xlu2 %1013, %v1228_v6   ;;  %p1053_p3 = pnand %p1052_p2, %p1048_p13 }
  0x29   : > { %1014 = vset.pattern.permute.xlu1 %v1125_v3  ;;  %275 = vperm.xlu0 %1009, %v1236_v7  }
  0x2a   : > { %1015 = vset.pattern.permute.xlu2 %v1128_v8  ;;  %337 = vperm.xlu1 %1014, %v1228_v6  }
  0x2b   : > { %415 = vperm.xlu2 %1015, %v1214_v1  }
  0x31   : > { %270 = vperm.xlu0 %1009, %v1244_v9  }
  0x32   : > { %333 = vperm.xlu1 %1014, %v1236_v7  }
  0x33   : > { %411 = vperm.xlu2 %1015, %v1219_v2  }
  0x39   : > { %265 = vperm.xlu0 %1009, %v1252_v10  }
  0x3a   : > { %329 = vperm.xlu1 %1014, %v1244_v9  }
  0x3b   : > { %407 = vperm.xlu2 %1015, %v1228_v6  }
  0x41   : > { %260 = vperm.xlu0 %1009, %v1260_v11  }
  0x42   : > { %325 = vperm.xlu1 %1014, %v1252_v10  }
  0x43   : > { %403 = vperm.xlu2 %1015, %v1236_v7  }
  0x49   : > { %255 = vperm.xlu0 %1009, %v1268_v12  }
  0x4a   : > { %321 = vperm.xlu1 %1014, %v1260_v11  }
  0x4b   : > { %399 = vperm.xlu2 %1015, %v1244_v9  }
  0x51   : > { %1016 = vset.pattern.permute.xlu0 %v1128_v8 }
  0x52   : > { %317 = vperm.xlu1 %1014, %v1268_v12   ;;  %391 = vperm.xlu0 %1016, %v1260_v11  }
  0x53   : > { %395 = vperm.xlu2 %1015, %v1252_v10  }
  0x5a   : > { %1017 = vset.pattern.permute.xlu1 %v1128_v8 }
  0x5b   : > { %387 = vperm.xlu1 %1017, %v1268_v12  }
  0x72   : > { %v342_v13 = vpop.permute.xlu2 %341 }
  0x7c   : > { %v281_v14 = vpop.permute.xlu2 %280 }
  0x85   : > { %v416_v17 = vpop.permute.xlu2 %415 }
  0x89   : > { %v346_v19 = vpop.permute.xlu1 %345 }
  0x8a   : > { %v235_v20 = vpop.permute.xlu0 %234 }
  0x8b   : > { %v239_v22 = vperm.slane %v235_v20, %v238_v18 }
  0x8d   : > { %v1293_v23 = vmul.f32 %v239_v22, %v1288_v21  ;;  %v412_v28 = vpop.permute.xlu2 %411 }
  0x8f   : > { %v294_v24 = vperm.slane %v1293_v23, 0  ;;  %v295_v25 = vperm.slane %v1293_v23, 2  ;;  %v348_v26 = vperm.slane %v1293_v23, 1  ;;  %v349_v27 = vperm.slane %v1293_v23, 3 }
  0x91   : > { %v1299_v29 = vperm.slane %v294_v24, 0  ;;  %v1301_v30 = vperm.slane %v295_v25, 0  ;;  %v1303_v31 = vperm.slane %v348_v26, 1  ;;  %v1305_v32 = vperm.slane %v349_v27, 1 }
  0x93   : > { %v368_v33 = vmul.f32 %v1303_v31, %v346_v19  ;;  %v369_v34 = vmul.f32 %v1305_v32, %v346_v19  ;;  %v291_v35 = vpop.permute.xlu0 %290  ;;  %v286_v36 = vpop.permute.xlu1 %285  ;;  %v366_v37 = vmul.f32 %v1303_v31, %v342_v13  ;;  %v367_v38 = vmul.f32 %v1305_v32, %v342_v13 }
  0x94   : > { %v314_v39 = vmul.f32 %v1299_v29, %v291_v35  ;;  %v315_v40 = vmul.f32 %v1301_v30, %v291_v35  ;;  %v312_v41 = vmul.f32 %v1299_v29, %v286_v36  ;;  %v313_v42 = vmul.f32 %v1301_v30, %v286_v36 }
  0x95   : > { %v408_v51 = vpop.permute.xlu2 %407  ;;  %v310_v58 = vmul.f32 %v1299_v29, %v281_v14  ;;  %v311_v61 = vmul.f32 %v1301_v30, %v281_v14 }
  0x96   : > { %v384_v43 = vadd.f32 %v368_v33, %v314_v39  ;;  %v385_v44 = vadd.f32 %v369_v34, %v315_v40  ;;  %v382_v45 = vadd.f32 %v366_v37, %v312_v41  ;;  %v383_v46 = vadd.f32 %v367_v38, %v313_v42 }
  0x98   : > { %v432_v47 = vadd.f32 %v416_v17, %v384_v43  ;;  %v433_v48 = vadd.f32 %v416_v17, %v385_v44  ;;  %v430_v49 = vadd.f32 %v412_v28, %v382_v45  ;;  %v431_v50 = vadd.f32 %v412_v28, %v383_v46 }
  0x9a   : > { %vm448_vm0 = vcmp.gt.f32.partialorder %v432_v47, 0.0  ;;  %v464_v52 = vmul.f32 0.01, %v432_v47  ;;  %vm449_vm1 = vcmp.gt.f32.partialorder %v433_v48, 0.0  ;;  %v465_v53 = vmul.f32 0.01, %v433_v48 }
  0x9b   : > { %v276_v54 = vpop.permute.xlu0 %275  ;;  %vm446_vm2 = vcmp.gt.f32.partialorder %v430_v49, 0.0  ;;  %v462_v55 = vmul.f32 0.01, %v430_v49  ;;  %v463_v56 = vmul.f32 0.01, %v431_v50  ;;  %vm447_vm3 = vcmp.gt.f32.partialorder %v431_v50, 0.0 }
  0x9c   : > { %v338_v57 = vpop.permute.xlu1 %337  ;;  %v480_v59 = vsel %vm448_vm0, %v432_v47, %v464_v52  ;;  %v481_v60 = vsel %vm449_vm1, %v433_v48, %v465_v53  ;;  %v308_v22 = vmul.f32 %v1299_v29, %v276_v54  ;;  %v309_v24 = vmul.f32 %v1301_v30, %v276_v54 }
  0x9d   : > { %v364_v62 = vmul.f32 %v1303_v31, %v338_v57  ;;  %v365_v63 = vmul.f32 %v1305_v32, %v338_v57  ;;  %547 = vmatpush.msra.mxu0 %v480_v59  ;;  %940 = vmatpush.msra.mxu2 %v480_v59  ;;  %v478_v3 = vsel %vm446_vm2, %v430_v49, %v462_v55  ;;  %v404_v25 = vpop.permute.xlu2 %403  ;;  %vm514_vm0 = vcmask 523264  }
  0x9e   : > { %588 = vmatpush.msra.mxu1 %v481_v60  ;;  %948 = vmatpush.msra.mxu3 %v481_v60  ;;  %v479_v13 = vsel %vm447_vm3, %v431_v50, %v463_v56 }
  0x9f   : > { %v380_v5 = vadd.f32 %v364_v62, %v310_v58  ;;  %v381_v8 = vadd.f32 %v365_v63, %v311_v61  ;;  %548 = vmatpush.msra.mxu0 %v478_v3  ;;  %941 = vmatpush.msra.mxu2 %v478_v3 }
  0xa0   : > { %589 = vmatpush.msra.mxu1 %v479_v13  ;;  %949 = vmatpush.msra.mxu3 %v479_v13  ;;  %v1130_v13 = vmov 3  }
  0xa1   : > { %v428_v15 = vadd.f32 %v408_v51, %v380_v5  ;;  %v429_v17 = vadd.f32 %v408_v51, %v381_v8  ;;  %1019 = vset.pattern.permute.xlu1 %v1130_v13  ;;  %1018 = vset.pattern.permute.xlu2 %v1130_v13 }
  0xa2   : > { %507 = vperm.xlu1 %1019, %v1219_v2   ;;  %511 = vperm.xlu2 %1018, %v1214_v1  }
  0xa3   : > { %v271_v19 = vpop.permute.xlu0 %270  ;;  %vm444_vm4 = vcmp.gt.f32.partialorder %v428_v15, 0.0  ;;  %v460_v14 = vmul.f32 0.01, %v428_v15  ;;  %vm445_vm5 = vcmp.gt.f32.partialorder %v429_v17, 0.0  ;;  %v461_v20 = vmul.f32 0.01, %v429_v17  ;;  %1020 = vset.pattern.permute.xlu0 %v1130_v13 }
  0xa4   : > { %v334_v26 = vpop.permute.xlu1 %333  ;;  %v306_v42 = vmul.f32 %v1299_v29, %v271_v19  ;;  %v307_v43 = vmul.f32 %v1301_v30, %v271_v19  ;;  %499 = vperm.xlu0 %1020, %v1236_v7   ;;  %v1131_v13 = vmov 4  }
  0xa5   : > { %v362_v27 = vmul.f32 %v1303_v31, %v334_v26  ;;  %v363_v28 = vmul.f32 %v1305_v32, %v334_v26  ;;  %v476_v33 = vsel %vm444_vm4, %v428_v15, %v460_v14  ;;  %v477_v34 = vsel %vm445_vm5, %v429_v17, %v461_v20  ;;  %v400_v49 = vpop.permute.xlu2 %399 }
  0xa6   : > { %549 = vmatpush.msra.mxu0 %v476_v33  ;;  %942 = vmatpush.msra.mxu2 %v476_v33 }
  0xa7   : > { %v378_v35 = vadd.f32 %v362_v27, %v308_v22  ;;  %v379_v36 = vadd.f32 %v363_v28, %v309_v24  ;;  %590 = vmatpush.msra.mxu1 %v477_v34  ;;  %950 = vmatpush.msra.mxu3 %v477_v34 }
  0xa9   : > { %v426_v37 = vadd.f32 %v404_v25, %v378_v35  ;;  %v427_v38 = vadd.f32 %v404_v25, %v379_v36 }
  0xaa   : > { %495 = vperm.xlu1 %1019, %v1244_v9   ;;  %503 = vperm.xlu2 %1018, %v1228_v6  }
  0xab   : > { %v266_v39 = vpop.permute.xlu0 %265  ;;  %vm442_vm6 = vcmp.gt.f32.partialorder %v426_v37, 0.0  ;;  %v458_v40 = vmul.f32 0.01, %v426_v37  ;;  %vm443_vm7 = vcmp.gt.f32.partialorder %v427_v38, 0.0  ;;  %v459_v41 = vmul.f32 0.01, %v427_v38 }
  0xac   : > { %v330_v44 = vpop.permute.xlu1 %329  ;;  %v304_v57 = vmul.f32 %v1299_v29, %v266_v39  ;;  %v305_v58 = vmul.f32 %v1301_v30, %v266_v39  ;;  %1021 = vset.pattern.permute.xlu0 %v1131_v13 }
  0xad   : > { %v360_v45 = vmul.f32 %v1303_v31, %v330_v44  ;;  %v361_v46 = vmul.f32 %v1305_v32, %v330_v44  ;;  %v474_v47 = vsel %vm442_vm6, %v426_v37, %v458_v40  ;;  %v475_v48 = vsel %vm443_vm7, %v427_v38, %v459_v41  ;;  %v396_v8 = vpop.permute.xlu2 %395 }
  0xae   : > { %550 = vmatpush.msra.mxu0 %v474_v47  ;;  %943 = vmatpush.msra.mxu2 %v474_v47 }
  0xaf   : > { %v376_v50 = vadd.f32 %v360_v45, %v306_v42  ;;  %v377_v51 = vadd.f32 %v361_v46, %v307_v43  ;;  %591 = vmatpush.msra.mxu1 %v475_v48  ;;  %951 = vmatpush.msra.mxu3 %v475_v48  ;;  %v225_v48 = vld [vmem:[%s1479_s2 + $0x10] sm:$0xff] }
  0xb1   : > { %v424_v52 = vadd.f32 %v400_v49, %v376_v50  ;;  %v425_v53 = vadd.f32 %v400_v49, %v377_v51  ;;  %v230_v49 = vld [vmem:[%s1479_s2 + $0x38] sm:$0xff]  ;;  %v227_v51 = vld [vmem:[%s1479_s2 + $0x20] sm:$0xff] }
  0xb2   : > { %487 = vperm.xlu1 %1019, %v1260_v11   ;;  %491 = vperm.xlu2 %1018, %v1252_v10   ;;  %v226_v50 = vld [vmem:[%s1479_s2 + $0x18] sm:$0xff] }
  0xb3   : > { %v261_v54 = vpop.permute.xlu0 %260  ;;  %vm440_vm8 = vcmp.gt.f32.partialorder %v424_v52, 0.0  ;;  %v456_v55 = vmul.f32 0.01, %v424_v52  ;;  %vm441_vm9 = vcmp.gt.f32.partialorder %v425_v53, 0.0  ;;  %v457_v56 = vmul.f32 0.01, %v425_v53 }
  0xb4   : > { %v326_v59 = vpop.permute.xlu1 %325  ;;  %v302_v1 = vmul.f32 %v1299_v29, %v261_v54  ;;  %v303_v2 = vmul.f32 %v1301_v30, %v261_v54 }
  0xb5   : > { %v358_v60 = vmul.f32 %v1303_v31, %v326_v59  ;;  %v359_v61 = vmul.f32 %v1305_v32, %v326_v59  ;;  %v472_v62 = vsel %vm440_vm8, %v424_v52, %v456_v55  ;;  %v473_v63 = vsel %vm441_vm9, %v425_v53, %v457_v56 }
  0xb6   : > { %551 = vmatpush.msra.mxu0 %v472_v62  ;;  %944 = vmatpush.msra.mxu2 %v472_v62 }
  0xb7   : > { %v374_v3 = vadd.f32 %v358_v60, %v304_v57  ;;  %v375_v5 = vadd.f32 %v359_v61, %v305_v58  ;;  %592 = vmatpush.msra.mxu1 %v473_v63  ;;  %952 = vmatpush.msra.mxu3 %v473_v63 }
  0xb9   : > { %v422_v15 = vadd.f32 %v396_v8, %v374_v3  ;;  %v423_v17 = vadd.f32 %v396_v8, %v375_v5  ;;  %v220_v3 = vld [vmem:[%s1478_s1] sm:$0xf]  ;;  %v222_v5 = vsub.f32 1.0, %v1209_v0 }
  0xba   : > { %483 = vperm.xlu2 %1018, %v1268_v12   ;;  %1022 = vset.pattern.permute.xlu1 %v1126_v4  ;;  %v224_v4 = vld [vmem:[%s1479_s2 + $0x8] sm:$0xff]  ;;  %v229_v12 = vld [vmem:[%s1479_s2 + $0x30] sm:$0xff] }
  0xbb   : > { %v256_v19 = vpop.permute.xlu0 %255  ;;  %vm438_vm10 = vcmp.gt.f32.partialorder %v422_v15, 0.0  ;;  %v454_v14 = vmul.f32 0.01, %v422_v15  ;;  %vm439_vm11 = vcmp.gt.f32.partialorder %v423_v17, 0.0  ;;  %v455_v20 = vmul.f32 0.01, %v423_v17  ;;  %671 = vperm.xlu0 %1021, %v220_v3   ;;  %244 = vperm.xlu1 %1022, %v222_v5  }
  0xbc   : > { %v322_v22 = vpop.permute.xlu1 %321  ;;  %v300_v6 = vmul.f32 %v1299_v29, %v256_v19  ;;  %v301_v9 = vmul.f32 %v1301_v30, %v256_v19  ;;  %v223_v29 = vld [vmem:[%s1479_s2] sm:$0xff]  ;;  %v228_v30 = vld [vmem:[%s1479_s2 + $0x28] sm:$0xff] }
  0xbd   : > { %v470_v24 = vsel %vm438_vm10, %v422_v15, %v454_v14  ;;  %v471_v25 = vsel %vm439_vm11, %v423_v17, %v455_v20  ;;  %v356_v26 = vmul.f32 %v1303_v31, %v322_v22  ;;  %v357_v27 = vmul.f32 %v1305_v32, %v322_v22 }
  0xbe   : > { %552 = vmatpush.msra.mxu0 %v470_v24  ;;  %945 = vmatpush.msra.mxu2 %v470_v24  ;;  %v1132_v15 = vmov 6  }
  0xbf   : > { %593 = vmatpush.msra.mxu1 %v471_v25  ;;  %953 = vmatpush.msra.mxu3 %v471_v25  ;;  %v372_v7 = vadd.f32 %v356_v26, %v302_v1  ;;  %v373_v28 = vadd.f32 %v357_v27, %v303_v2 }
  0xc2   : > { %1023 = vset.pattern.permute.xlu2 %v1132_v15 }
  0xc3   : > { %722 = vperm.xlu2 %1023, %v1209_v0   ;;  %1024 = vset.pattern.permute.xlu0 %v1132_v15 }
  0xc4   : > { %v318_v33 = vpop.permute.xlu1 %317  ;;  %v392_v34 = vpop.permute.xlu0 %391 }
  0xc5   : > { %v420_v35 = vadd.f32 %v392_v34, %v372_v7  ;;  %v421_v36 = vadd.f32 %v392_v34, %v373_v28  ;;  %v354_v39 = vmul.f32 %v1303_v31, %v318_v33  ;;  %v355_v40 = vmul.f32 %v1305_v32, %v318_v33 }
  0xc7   : > { %vm436_vm12 = vcmp.gt.f32.partialorder %v420_v35, 0.0  ;;  %v452_v37 = vmul.f32 0.01, %v420_v35  ;;  %vm437_vm13 = vcmp.gt.f32.partialorder %v421_v36, 0.0  ;;  %v453_v38 = vmul.f32 0.01, %v421_v36 }
  0xc8   : > { %v370_v43 = vadd.f32 %v354_v39, %v300_v6  ;;  %v371_v44 = vadd.f32 %v355_v40, %v301_v9 }
  0xc9   : > { %v468_v41 = vsel %vm436_vm12, %v420_v35, %v452_v37  ;;  %v469_v42 = vsel %vm437_vm13, %v421_v36, %v453_v38 }
  0xca   : > { %553 = vmatpush.msra.mxu0 %v468_v41  ;;  %946 = vmatpush.msra.mxu2 %v468_v41 }
  0xcb   : > { %594 = vmatpush.msra.mxu1 %v469_v42  ;;  %954 = vmatpush.msra.mxu3 %v469_v42 }
  0xcd   : > { %v388_v45 = vpop.permute.xlu1 %387 }
  0xce   : > { %v418_v31 = vadd.f32 %v388_v45, %v370_v43  ;;  %v419_v46 = vadd.f32 %v388_v45, %v371_v44 }
  0xd0   : > { %vm434_vm14 = vcmp.gt.f32.partialorder %v418_v31, 0.0  ;;  %v450_v32 = vmul.f32 0.01, %v418_v31  ;;  %vm435_vm15 = vcmp.gt.f32.partialorder %v419_v46, 0.0  ;;  %v451_v47 = vmul.f32 0.01, %v419_v46 }
  0xd2   : > { %v466_v10 = vsel %vm434_vm14, %v418_v31, %v450_v32  ;;  %v467_v11 = vsel %vm435_vm15, %v419_v46, %v451_v47 }
  0xd3   : > { %554 = vmatpush.msra.mxu0 %v466_v10  ;;  %947 = vmatpush.msra.mxu2 %v466_v10 }
  0xd4   : > { %595 = vmatpush.msra.mxu1 %v467_v11  ;;  %955 = vmatpush.msra.mxu3 %v467_v11 }
  0xd5   : > { %914 = vmatmul.msk.f32.vlgmr.msra.gmra.mxu0 %vm514_vm0, %v223_v29  ;;  %919 = vmatmul.msk.f32.vlgmr.msra.gmra.mxu2 %vm514_vm0, %v228_v30 }
  0xd6   : > { %922 = vmatmul.msk.f32.vlgmr.msra.gmra.mxu1 %vm514_vm0, %v223_v29  ;;  %927 = vmatmul.msk.f32.vlgmr.msra.gmra.mxu3 %vm514_vm0, %v228_v30 }
  0xdd   : > { %915 = vmatmul.msk.f32.gmra.mxu0 %vm514_vm0, %v224_v4  ;;  %920 = vmatmul.msk.f32.gmra.mxu2 %vm514_vm0, %v229_v12 }
  0xde   : > { %923 = vmatmul.msk.f32.gmra.mxu1 %vm514_vm0, %v224_v4  ;;  %928 = vmatmul.msk.f32.gmra.mxu3 %vm514_vm0, %v229_v12 }
  0xe5   : > { %916 = vmatmul.msk.f32.gmra.mxu0 %vm514_vm0, %v225_v48  ;;  %921 = vmatmul.msk.f32.gmra.mxu2 %vm514_vm0, %v230_v49 }
  0xe6   : > { %924 = vmatmul.msk.f32.gmra.mxu1 %vm514_vm0, %v225_v48  ;;  %929 = vmatmul.msk.f32.gmra.mxu3 %vm514_vm0, %v230_v49 }
  0xed   : > { %917 = vmatmul.msk.f32.gmra.mxu0 %vm514_vm0, %v226_v50 }
  0xee   : > { %925 = vmatmul.msk.f32.gmra.mxu1 %vm514_vm0, %v226_v50 }
  0xf5   : > { %918 = vmatmul.msk.f32.gmra.mxu0 %vm514_vm0, %v227_v51 }
  0xf6   : > { %926 = vmatmul.msk.f32.gmra.mxu1 %vm514_vm0, %v227_v51 }
  0xfc   : > { %v512_v54 = vpop.permute.xlu2 %511 }
 0x104   : > { %v504_v60 = vpop.permute.xlu2 %503 }
 0x10c   : > { %v492_v26 = vpop.permute.xlu2 %491 }
 0x114   : > { %v508_v59 = vpop.permute.xlu1 %507  ;;  %v484_v47 = vpop.permute.xlu2 %483 }
 0x116   : > { %v500_v41 = vpop.permute.xlu0 %499 }
 0x11c   : > { %v496_v17 = vpop.permute.xlu1 %495 }
 0x124   : > { %v488_v42 = vpop.permute.xlu1 %487 }
 0x152   : > { %v1388_v52 = vpop.f32.mrf.mxu0 }
 0x153   : > { %v1390_v53 = vpop.f32.mrf.mxu1  ;;  %v557_v50 = vadd.f32 %v1388_v52, %v484_v47 }
 0x155   : > { %v637_v52 = vmul.f32 0.01, %v557_v50  ;;  %vm621_vm15 = vcmp.gt.f32.partialorder %v557_v50, 0.0 }
 0x157   : > { %v653_v13 = vsel %vm621_vm15, %v557_v50, %v637_v52 }
 0x158   : > { %v571_v55 = vpop.f32.mrf.mxu2 }
 0x159   : > { %v612_v56 = vpop.f32.mrf.mxu3  ;;  %v572_v22 = vadd.f32 %v571_v55, %v504_v60  ;;  %v598_v55 = vadd.f32 %v1390_v53, %v484_v47 }
 0x15a   : > { %v1392_v57 = vpop.f32.mrf.mxu0  ;;  %v613_v27 = vadd.f32 %v612_v56, %v504_v60 }
 0x15b   : > { %v1394_v58 = vpop.f32.mrf.mxu1  ;;  %v647_v36 = vmul.f32 0.01, %v572_v22  ;;  %vm631_vm5 = vcmp.gt.f32.partialorder %v572_v22, 0.0  ;;  %v560_v10 = vadd.f32 %v1392_v57, %v488_v42  ;;  %v638_v53 = vmul.f32 0.01, %v598_v55 }
 0x15c   : > { %v648_v38 = vmul.f32 0.01, %v613_v27  ;;  %vm632_vm6 = vcmp.gt.f32.partialorder %v613_v27, 0.0  ;;  %v601_v30 = vadd.f32 %v1394_v58, %v488_v42 }
 0x15d   : > { %v663_v9 = vsel %vm631_vm5, %v572_v22, %v647_v36  ;;  %vm623_vm13 = vcmp.gt.f32.partialorder %v560_v10, 0.0 }
 0x15e   : > { %v664_v45 = vsel %vm632_vm6, %v613_v27, %v648_v38  ;;  %vm624_vm14 = vcmp.gt.f32.partialorder %v601_v30, 0.0 }
 0x160   : > { %v574_v61 = vpop.f32.mrf.mxu2 }
 0x161   : > { %v615_v62 = vpop.f32.mrf.mxu3  ;;  %v575_v19 = vadd.f32 %v574_v61, %v508_v59  ;;  %v640_v61 = vmul.f32 0.01, %v601_v30 }
 0x162   : > { %v562_v63 = vpop.f32.mrf.mxu0  ;;  %v616_v14 = vadd.f32 %v615_v62, %v508_v59  ;;  %v639_v59 = vmul.f32 0.01, %v560_v10 }
 0x163   : > { %v603_v8 = vpop.f32.mrf.mxu1  ;;  %v649_v33 = vmul.f32 0.01, %v575_v19  ;;  %vm633_vm3 = vcmp.gt.f32.partialorder %v575_v19, 0.0  ;;  %v563_v31 = vadd.f32 %v562_v63, %v492_v26  ;;  %v656_v5 = vsel %vm624_vm14, %v601_v30, %v640_v61 }
 0x164   : > { %v650_v35 = vmul.f32 0.01, %v616_v14  ;;  %vm634_vm4 = vcmp.gt.f32.partialorder %v616_v14, 0.0  ;;  %v604_v11 = vadd.f32 %v603_v8, %v492_v26  ;;  %v655_v3 = vsel %vm623_vm13, %v560_v10, %v639_v59  ;;  %v231_v8 = vld [vmem:[%s1479_s2 + $0x40] sm:$0xf] }
 0x165   : > { %v665_v39 = vsel %vm633_vm3, %v575_v19, %v649_v33  ;;  %vm625_vm11 = vcmp.gt.f32.partialorder %v563_v31, 0.0 }
 0x166   : > { %v666_v40 = vsel %vm634_vm4, %v616_v14, %v650_v35  ;;  %v642_v57 = vmul.f32 0.01, %v604_v11  ;;  %vm626_vm12 = vcmp.gt.f32.partialorder %v604_v11, 0.0  ;;  %v773_v35 = vlaneseq }
 0x168   : > { %v577_v20 = vpop.f32.mrf.mxu2  ;;  %v658_v63 = vsel %vm626_vm12, %v604_v11, %v642_v57 }
 0x169   : > { %v578_v24 = vadd.f32 %v577_v20, %v512_v54  ;;  %v618_v25 = vpop.f32.mrf.mxu3  ;;  %v672_v20 = vpop.permute.xlu0 %671 }
 0x16a   : > { %v619_v1 = vadd.f32 %v618_v25, %v512_v54  ;;  %v565_v2 = vpop.f32.mrf.mxu0  ;;  %v641_v54 = vmul.f32 0.01, %v563_v31 }
 0x16b   : > { %v606_v7 = vpop.f32.mrf.mxu1  ;;  %vm635_vm1 = vcmp.gt.f32.partialorder %v578_v24, 0.0  ;;  %v651_v28 = vmul.f32 0.01, %v578_v24  ;;  %v566_v6 = vadd.f32 %v565_v2, %v496_v17 }
 0x16c   : > { %vm636_vm2 = vcmp.gt.f32.partialorder %v619_v1, 0.0  ;;  %v652_v34 = vmul.f32 0.01, %v619_v1  ;;  %v607_v43 = vadd.f32 %v606_v7, %v496_v17  ;;  %v657_v62 = vsel %vm625_vm11, %v563_v31, %v641_v54  ;;  %v1410_v17 = vpop.permute.xlu1 %244 }
 0x16d   : > { %v667_v0 = vsel %vm635_vm1, %v578_v24, %v651_v28  ;;  %v643_v12 = vmul.f32 0.01, %v566_v6  ;;  %vm627_vm9 = vcmp.gt.f32.partialorder %v566_v6, 0.0  ;;  %vm622_vm1 = vcmp.gt.f32.partialorder %v598_v55, 0.0  ;;  %v723_v24 = vpop.permute.xlu2 %722 }
 0x16e   : > { %685 = vmatpush.msrb.mxu2 %v667_v0  ;;  %v668_v37 = vsel %vm636_vm2, %v619_v1, %v652_v34  ;;  %v644_v49 = vmul.f32 0.01, %v607_v43  ;;  %vm628_vm10 = vcmp.gt.f32.partialorder %v607_v43, 0.0  ;;  %v654_v15 = vsel %vm622_vm1, %v598_v55, %v638_v53 }
 0x16f   : > { %705 = vmatpush.msrb.mxu3 %v668_v37  ;;  %v659_v58 = vsel %vm627_vm9, %v566_v6, %v643_v12  ;;  %v250_v19 = vperm.slane %v1410_v17, %v238_v18  ;;  %vm775_vm2 = vcmp.lt.s32.totalorder %v773_v35, 256 }
 0x170   : > { %686 = vmatpush.msrb.mxu2 %v665_v39  ;;  %v660_v60 = vsel %vm628_vm10, %v607_v43, %v644_v49 }
 0x171   : > { %706 = vmatpush.msrb.mxu3 %v666_v40  ;;  %v252_v14 = vmul.f32 %v250_v19, %v1288_v21  ;;  %v717_v21 = vrot.slane %v1410_v17, 6 }
 0x172   : > { %v568_v44 = vpop.f32.mrf.mxu0  ;;  %687 = vmatpush.msrb.mxu2 %v663_v9 }
 0x173   : > { %v569_v46 = vadd.f32 %v568_v44, %v500_v41  ;;  %v609_v32 = vpop.f32.mrf.mxu1  ;;  %707 = vmatpush.msrb.mxu3 %v664_v45  ;;  %732 = vst [vmem:[#allocation1] ss:$4 sm:$0xff] %v252_v14 }
 0x174   : > { %v610_v29 = vadd.f32 %v609_v32, %v500_v41 }
 0x175   : > { %vm629_vm7 = vcmp.gt.f32.partialorder %v569_v46, 0.0  ;;  %v645_v4 = vmul.f32 0.01, %v569_v46 }
 0x176   : > { %vm630_vm8 = vcmp.gt.f32.partialorder %v610_v29, 0.0  ;;  %v646_v48 = vmul.f32 0.01, %v610_v29 }
 0x177   : > { %v661_v51 = vsel %vm629_vm7, %v569_v46, %v645_v4 }
 0x178   : > { %688 = vmatpush.msrb.mxu2 %v661_v51  ;;  %v662_v56 = vsel %vm630_vm8, %v610_v29, %v646_v48 }
 0x179   : > { %708 = vmatpush.msrb.mxu3 %v662_v56 }
 0x17a   : > { %689 = vmatpush.msrb.mxu2 %v659_v58  ;;  %v733_v38 = vld.sshfl [vmem:[#allocation1] sm:$0xff pattern:$0x73625140]  ;;  %v734_v39 = vld.sshfl [vmem:[#allocation1 + $0x8] sm:$0xff pattern:$0x73625140] }
 0x17b   : > { %709 = vmatpush.msrb.mxu3 %v660_v60 }
 0x17c   : > { %690 = vmatpush.msrb.mxu2 %v657_v62 }
 0x17d   : > { %710 = vmatpush.msrb.mxu3 %v658_v63 }
 0x17e   : > { %691 = vmatpush.msrb.mxu2 %v655_v3 }
 0x17f   : > { %711 = vmatpush.msrb.mxu3 %v656_v5 }
 0x180   : > { %692 = vmatpush.msrb.mxu2 %v653_v13 }
 0x181   : > { %712 = vmatpush.msrb.mxu3 %v654_v15  ;;  %930 = vmatmul.msk.f32.vlgmr.msrb.gmra.mxu2 %vm514_vm0, %v231_v8 }
 0x182   : > { %931 = vmatmul.msk.f32.vlgmr.msrb.gmra.mxu3 %vm514_vm0, %v231_v8  ;;  %vm770_vm0 = vcmask 1040384  }
 0x204   : > { %v694_v22 = vpop.f32.mrf.mxu2 }
 0x205   : > { %v695_v25 = vadd.f32 %v694_v22, %v672_v20  ;;  %v714_v26 = vpop.f32.mrf.mxu3 }
 0x206   : > { %v715_v27 = vadd.f32 %v714_v26, %v672_v20 }
 0x207   : > { %v725_v1 = vmul.f32 %v723_v24, %v695_v25  ;;  %v719_v36 = vmul.f32 %v717_v21, %v695_v25 }
 0x208   : > { %v726_v2 = vmul.f32 %v723_v24, %v715_v27  ;;  %v720_v37 = vmul.f32 %v717_v21, %v715_v27 }
 0x209   : > { %v727_v7 = vmul.f32 1.442695, %v725_v1  ;;  %v757_v16 = vmul.f32 %v725_v1, %v1410_v17  ;;  %v741_v44 = vrot.slane %v719_v36, 2 }
 0x20a   : > { %v729_v28 = vmul.f32 1.442695, %v726_v2  ;;  %v758_v18 = vmul.f32 %v726_v2, %v1410_v17  ;;  %v742_v45 = vrot.slane %v720_v37, 2 }
 0x20b   : > { %1025 = vpow2.f32 %v727_v7  ;;  %v761_v33 = vrot.slane %v757_v16, 1 }
 0x20c   : > { %1027 = vpow2.f32 %v729_v28  ;;  %v762_v34 = vrot.slane %v758_v18, 1 }
 0x20d   : > { %v765_v40 = vadd.f32 %v761_v33, %v757_v16 }
 0x20e   : > { %v766_v0 = vadd.f32 %v762_v34, %v758_v18 }
 0x210   : > { %v769_v41 = vrot.slane %v766_v0, 7 }
 0x211   : > { %v1026_v42 = vpop.eup %1025 }
 0x212   : > { %v1028_v6 = vpop.eup %1027  ;;  %v737_v9 = vmul.f32 %v1026_v42, %v733_v38  ;;  %v771_v43 = vsel %vm770_vm0, %v765_v40, %v769_v41 }
 0x213   : > { %v738_v31 = vmul.f32 %v1028_v6, %v734_v39  ;;  %777 = vst.msk [vmem:[%s202_s23] sm:$0x3] %vm775_vm2, %v771_v43 }
 0x214   : > { %1056 = shalt.err (!%p1053_p3)
}
 0x215   : > { %957 = dma.vmem_to_hbm [thread:$0]  (%p1196_p5), %s812_s27, 32, %s814_s29, %s784_s5   ;;  %v745_v46 = vadd.f32 %v741_v44, %v737_v9  ;;  %v746_v32 = vadd.f32 %v742_v45, %v738_v31  ;;  %vm752_vm3 = vcmask 1041408  }
 0x216   : > { %s795_s20 = scalar_lea.hbm %s1480_s3, %s939_s30  ;;  %s195_s22 = scalar_lea.vmem [#allocation2], %s910_s28 }
 0x217   : > { %v748_v47 = vmul.f32 %v746_v32, %v1410_v17  ;;  %v747_v10 = vmul.f32 %v745_v46, %v1410_v17  ;;  %s797_s23 = sshll.u32 %s195_s22, 4  ;;  %s799_s6 = sshll.u32 %s795_s20, 4  ;;  %s798_s23 = int_to_ptr.vmem [resolvable:$true] %s797_s23  ;;  %s800_s6 = int_to_ptr.hbm [resolvable:$true] %s799_s6 }
 0x218   : > { %s779_s27 = scalar_lea.sflag [#allocation3], %s1417_s12  ;;  %s1071_s29 = sshra.s32 %s800_s6, 4  ;;  %s1072_s29 = int_to_ptr.hbm [resolvable:$true] %s1071_s29 }
 0x219   : > { %v751_v11 = vrot.slane %v748_v47, 6  ;;  %s1073_s30 = scalar_lea.hbm %s1072_s29, 4  ;;  %s1077_s28 = scalar_lea.hbm %s1480_s3, 16 }
 0x21a   : > { %p1074_p4 = scmp.ne.s32.totalorder %s1072_s29, %s1073_s30  ;;  %p1078_p9 = scmp.lt.s32.totalorder %s1072_s29, %s1480_s3 }
 0x21b   : > { %v753_v29 = vsel %vm752_vm3, %v747_v10, %v751_v11  ;;  %p1079_p10 = scmp.lt.s32.totalorder %s1077_s28, %s1073_s30 }
 0x21c   : > { %v755_v30 = vadd.f32 %v753_v29, %v1293_v23  ;;  %p1075_p7 = pnand %p1074_p4, %p1196_p5 }
 0x21d   : > { %p1080_p11 = por %p1079_p10, %p1078_p9 }
 0x21e   : > { %756 = vst [vmem:[%s195_s22] sm:$0xf] %v755_v30  ;;  %p1076_p8 = pneg %p1075_p7 }
 0x220   : > { %p1081_p12 = pnand %p1080_p11, %p1076_p8 }
 0x222   : > { %1084 = shalt.err (!%p1081_p12)
}
 0x223   : > { %956 = dma.vmem_to_hbm [thread:$0]  (%p1196_p5), %s798_s23, 64, %s800_s6, %s779_s27  }
 0x224 PF: > { %p967_p13 = scmp.ge.s32.totalorder %s1123_s18, 2  ;;  %s825_s12 = sand.u32 1, %s1111_s15  }
 0x225   : > { %s826_s10 = scalar_lea.sflag [#allocation3], %s825_s12 }
 0x226   : > { %p961_p0 = pnand %p967_p13, %p1200_p6 }
 0x228   : > { %p962_p1 = pneg %p961_p0 }
 0x22a   : > { %1102 = dma.done.wait (%p962_p1), %s826_s10, 64  }
 0x22b   : > { %1104 = vsyncadd (%p962_p1), %s826_s10, 4294967232  ;;  %s836_s11 = scalar_lea.sflag [#allocation5], %s825_s12 }
 0x22c   : > { %1106 = dma.done.wait (%p962_p1), %s836_s11, 32  }
 0x22d   : > { %1108 = vsyncadd (%p962_p1), %s836_s11, 4294967264  ;;  %p18_p5 = scmp.ge.s32.totalorder %s1183_s21, 6   ;;  %s1484_s15 = smov %s1115_s16 }
 0x22e   : > { %s1485_s16 = smov %s1119_s17  ;;  %s1486_s17 = smov %s1194_s24 }
 0x22f   : > { %s1487_s18 = smov %s1183_s21  ;;  %20 = sbr.rel (!%p18_p5) target bundleno = 5 (0x5), region = 84 }
 0x234   :  { %842 = vsyncpa [#allocation3], 1 }
 0x235   :  { %844 = vsyncpa [#allocation3 + $0x1], 1 }
 0x236   :  { %845 = vsyncpa [#allocation5], 1 }
 0x237   :  { %847 = vsyncpa [#allocation5 + $0x1], 1 }

</bundles_post_ra>
